<compile_context>
chip_gen: v7x
topology: tpu7x:2x2x1
jax: 0.10.0
libtpu: 0.0.40
codegen_flags: <defaults>
</compile_context>

<pallas_src>
import functools

import jax
import jax.numpy as jnp
from jax.experimental import pallas as pl
from jax.experimental.pallas import tpu as pltpu


def _downblock_kernel(x_ref, w_ref, b_ref, *rest, norm, pool, K, Cin, Cout,
                      H, W, Ho, Wo, Hp, Wp, slope=0.2, eps=1e-5):
    """One batch element per grid step.

    x_ref  : (1, Cin, H*W)     bf16  flattened NCHW image
    w_ref  : (K, Cout, K*Cin)  bf16  taps, layout [kh, o, kw*Cin + c]
    b_ref  : (Cout, 1)         f32
    rest   : [gamma (Cout,1), beta (Cout,1), mask (1, Ho*W)]  (if norm)
             [sw2 (2W, Wp_pad)]                               (if pool)
             o_ref   (1, Cout, Ho*W) or (1, Hp*Cout, Wp_pad)
             xs_ref  (K*Cin, H*W) bf16 scratch (kw-shifted image copies)
             [rs_ref (Hp*Cout, 2W) f32 scratch]               (if pool)
    """
    idx = 0
    if norm:
        g_ref = rest[idx]; idx += 1
        be_ref = rest[idx]; idx += 1
        mask_ref = rest[idx]; idx += 1
    if pool:
        sw_ref = rest[idx]; idx += 1
    o_ref = rest[idx]; idx += 1
    xs_ref = rest[idx]; idx += 1
    if pool:
        rs_ref = rest[idx]; idx += 1

    HW = H * W
    Lfull = Ho * W          # full-stride activation width (garbage at wo >= Wo)

    # ---- stage the K kw-shifted copies of the image ONCE per grid step ------
    # xs[kw*Cin + c, p] = x[c, p + kw]; the tiny tails are zeroed so that no
    # uninitialized VMEM can ever reach the stats / pooling matmuls.
    xs_ref[0:Cin, :] = x_ref[0]
    for kw in range(1, K):
        xs_ref[kw * Cin:(kw + 1) * Cin, 0:HW - kw] = x_ref[0, :, kw:HW]
        xs_ref[kw * Cin:(kw + 1) * Cin, HW - kw:HW] = jnp.zeros(
            (Cin, kw), dtype=xs_ref.dtype)

    # ---- conv: K matmuls, contraction K*Cin (taps folded into MXU depth) ----
    # acc[o, ho*W + wo] == conv(x)[o, ho, wo] for wo < Wo; columns wo >= Wo are
    # row-wrap garbage (masked out of the stats, never kept as valid output).
    acc = jnp.dot(w_ref[0], xs_ref[:, 0:Lfull],
                  preferred_element_type=jnp.float32)
    for kh in range(1, K):
        acc = acc + jnp.dot(w_ref[kh], xs_ref[:, kh * W:kh * W + Lfull],
                            preferred_element_type=jnp.float32)

    if norm:
        # InstanceNorm2d(affine): the conv bias cancels exactly under mean
        # subtraction, so it is skipped.  One-pass (sum, sumsq) stats over the
        # Ho*Wo valid positions; the affine is folded into a single per-channel
        # scale/shift so the big slab only sees one mul + one add.
        L = Ho * Wo
        m = mask_ref[...]                                   # (1, Lfull)
        ym = acc * m
        ssum = jnp.sum(ym, axis=1, keepdims=True)           # (Cout, 1)
        ssq = jnp.sum(ym * acc, axis=1, keepdims=True)
        # TODO(synk): once spatial grid tiling is added, carry partial
        # (sum, sumsq) per tile (or push the reduction onto the MXU) instead of
        # a full-width cross-lane reduce.
        mean = ssum * (1.0 / L)
        var = jnp.maximum(ssq * (1.0 / L) - mean * mean, 0.0)
        s = g_ref[...] * jax.lax.rsqrt(var + eps)            # (Cout, 1)
        t = be_ref[...] - mean * s                           # (Cout, 1)
        y = acc * s + t
    else:
        y = acc + b_ref[...]

    # LeakyReLU(0.2)
    y = jnp.where(y >= 0, y, slope * y)

    if pool:
        # avg_pool2d(2,2): copy each output-row pair (2*W contiguous lanes,
        # aligned when W%128==0) into a (Hp*Cout, 2W) scratch, then ONE MXU
        # matmul against the 0.25-weighted (2W, Wp_pad) matrix does both the
        # row-pair sum and the width pooling, followed by ONE lane-dense
        # 128-aligned store of the whole block.
        for hp in range(Hp):
            rs_ref[hp * Cout:(hp + 1) * Cout, :] = (
                y[:, 2 * hp * W:2 * hp * W + 2 * W])
        pooled = jnp.dot(rs_ref[...], sw_ref[...],
                         preferred_element_type=jnp.float32)
        o_ref[0] = pooled.astype(o_ref.dtype)
    else:
        # Single full-slab store (keeps the W stride; host slices wo >= Wo).
        o_ref[0] = y.astype(o_ref.dtype)


def _invariant_spec(shape):
    """BlockSpec for a grid-invariant operand; request single buffering."""
    rank = len(shape)
    index_map = lambda n: (0,) * rank
    try:
        return pl.BlockSpec(shape, index_map, pipeline_mode=pl.Buffered(1))
    except TypeError:  # compatibility guard for Pallas without pipeline_mode
        return pl.BlockSpec(shape, index_map)


def down_block_2d(x, weight, bias, gamma=None, beta=None, *,
                  norm=False, pool=False, out_dtype=jnp.float32):
    """x: (N, Cin, H, W) f32; weight: (Cout, Cin, K, K); bias: (Cout,).
    Returns NCHW `out_dtype` matching the PyTorch DownBlock2d forward."""
    N, Cin, H, W = x.shape
    Cout, _, K, _ = weight.shape
    Ho, Wo = H - K + 1, W - K + 1
    HW, Lfull = H * W, (H - K + 1) * W

    # Host-side glue (cheap): flatten x (no transpose, no im2col), cast MXU
    # operands to bf16 (f32 accumulation in-kernel), reorder conv taps to
    # [kh, o, kw*Cin + c] so each kh is one (Cout, K*Cin) matmul LHS.
    x_flat = x.reshape(N, Cin, HW).astype(jnp.bfloat16)
    w_kh = weight.transpose(2, 0, 3, 1).reshape(K, Cout, K * Cin)
    w_kh = w_kh.astype(jnp.bfloat16)
    b2 = bias.reshape(Cout, 1).astype(jnp.float32)

    inputs = [x_flat, w_kh, b2]
    in_specs = [
        pl.BlockSpec((1, Cin, HW), lambda n: (n, 0, 0)),
        _invariant_spec((K, Cout, K * Cin)),
        _invariant_spec((Cout, 1)),
    ]

    if norm:
        mask = ((jnp.arange(Lfull) % W) < Wo).astype(jnp.float32)
        inputs += [gamma.reshape(Cout, 1).astype(jnp.float32),
                   beta.reshape(Cout, 1).astype(jnp.float32),
                   mask.reshape(1, Lfull)]
        in_specs += [_invariant_spec((Cout, 1)),
                     _invariant_spec((Cout, 1)),
                     _invariant_spec((1, Lfull))]

    scratch_shapes = [pltpu.VMEM((K * Cin, HW), jnp.bfloat16)]

    if pool:
        Hp, Wp = Ho // 2, Wo // 2
        Wp_pad = ((Wp + 127) // 128) * 128          # lane-aligned output rows
        j = jnp.arange(2 * W)[:, None] % W          # (2W, 1) in-row position
        wp = jnp.arange(Wp_pad)[None, :]            # (1, Wp_pad)
        sw2 = (((j // 2) == wp) & (wp < Wp)).astype(jnp.float32) * 0.25
        inputs.append(sw2)
        in_specs.append(_invariant_spec((2 * W, Wp_pad)))
        scratch_shapes.append(pltpu.VMEM((Hp * Cout, 2 * W), jnp.float32))
        out_shape = jax.ShapeDtypeStruct((N, Hp * Cout, Wp_pad), out_dtype)
        out_spec = pl.BlockSpec((1, Hp * Cout, Wp_pad), lambda n: (n, 0, 0))
    else:
        Hp = Wp = 0
        out_shape = jax.ShapeDtypeStruct((N, Cout, Lfull), out_dtype)
        out_spec = pl.BlockSpec((1, Cout, Lfull), lambda n: (n, 0, 0))

    kernel = functools.partial(
        _downblock_kernel, norm=norm, pool=pool, K=K, Cin=Cin, Cout=Cout,
        H=H, W=W, Ho=Ho, Wo=Wo, Hp=Hp, Wp=Wp)

    out = pl.pallas_call(
        kernel,
        out_shape=out_shape,
        grid_spec=pltpu.PrefetchScalarGridSpec(
            num_scalar_prefetch=0,
            grid=(N,),
            in_specs=in_specs,
            out_specs=out_spec,
            scratch_shapes=scratch_shapes),
        compiler_params=pltpu.CompilerParams(
            dimension_semantics=("parallel",),
            vmem_limit_bytes=48 * 1024 * 1024),
    )(*inputs)

    if pool:
        # (N, Hp*Cout, Wp_pad) -> (N, Cout, Hp, Wp): cheap host-side slice +
        # transpose of the (small) pooled output -- layout plumbing only.
        out = out.reshape(N, Hp, Cout, Wp_pad)[:, :, :, :Wp]
        return out.transpose(0, 2, 1, 3)
    # (N, Cout, Ho*W) -> NCHW: contiguous reshape + slice of garbage columns.
    return out.reshape(N, Cout, Ho, W)[:, :, :, :Wo]


def _reference(x, weight, bias, gamma, beta, *, norm, pool):
    out = jax.lax.conv_general_dilated(
        x, weight, window_strides=(1, 1), padding="VALID",
        dimension_numbers=("NCHW", "OIHW", "NCHW"))
    out = out + bias[None, :, None, None]
    if norm:
        mu = out.mean(axis=(2, 3), keepdims=True)
        var = ((out - mu) ** 2).mean(axis=(2, 3), keepdims=True)
        out = (out - mu) / jnp.sqrt(var + 1e-5)
        out = out * gamma[None, :, None, None] + beta[None, :, None, None]
    out = jnp.where(out >= 0, out, 0.2 * out)
    if pool:
        n, c, hc, wc = out.shape
        hp, wp = hc // 2, wc // 2
        out = out[:, :, :hp * 2, :wp * 2].reshape(n, c, hp, 2, wp, 2)
        out = out.mean(axis=(3, 5))
    return out


if __name__ == "__main__":
    key = jax.random.PRNGKey(0)
    k1, k2, k3, k4, k5 = jax.random.split(key, 5)

    N, Cin, H, W = 2, 4, 16, 16
    Cout, K = 8, 4

    x = jax.random.normal(k1, (N, Cin, H, W), dtype=jnp.float32)
    weight = jax.random.normal(k2, (Cout, Cin, K, K), dtype=jnp.float32) * 0.1
    bias = jax.random.normal(k3, (Cout,), dtype=jnp.float32) * 0.1
    gamma = 1.0 + 0.1 * jax.random.normal(k4, (Cout,), dtype=jnp.float32)
    beta = 0.1 * jax.random.normal(k5, (Cout,), dtype=jnp.float32)

    # Full path: conv + InstanceNorm2d(affine) + LeakyReLU(0.2) + AvgPool2d(2,2).
    out = down_block_2d(x, weight, bias, gamma, beta, norm=True, pool=True)
    out = jax.block_until_ready(out)
    ref = jax.block_until_ready(
        _reference(x, weight, bias, gamma, beta, norm=True, pool=True))
    assert out.shape == ref.shape, (out.shape, ref.shape)
    err = float(jnp.max(jnp.abs(out - ref)))
    # Tolerance loosened because the conv operands are bf16 (f32 accumulation).
    assert jnp.allclose(out, ref, atol=3e-2, rtol=3e-2), err

    # Plain path: conv + bias + LeakyReLU (no norm, no pool).
    out2 = down_block_2d(x, weight, bias, norm=False, pool=False)
    out2 = jax.block_until_ready(out2)
    ref2 = jax.block_until_ready(
        _reference(x, weight, bias, None, None, norm=False, pool=False))
    assert out2.shape == ref2.shape, (out2.shape, ref2.shape)
    err2 = float(jnp.max(jnp.abs(out2 - ref2)))
    assert jnp.allclose(out2, ref2, atol=3e-2, rtol=3e-2), err2

    print("KERNEL_OK")
</pallas_src>

<mosaic_0001>
module attributes {stable_mosaic.version = 11 : i64} {
  func.func @_downblock_kernel(%arg0: i32, %arg1: memref<1x4x256xbf16, #tpu.memory_space<vmem>>, %arg2: memref<4x8x16xbf16, #tpu.memory_space<vmem>>, %arg3: memref<8x1xf32, #tpu.memory_space<vmem>>, %arg4: memref<8x1xf32, #tpu.memory_space<vmem>>, %arg5: memref<8x1xf32, #tpu.memory_space<vmem>>, %arg6: memref<1x208xf32, #tpu.memory_space<vmem>>, %arg7: memref<32x128xf32, #tpu.memory_space<vmem>>, %arg8: memref<1x48x128xf32, #tpu.memory_space<vmem>>, %arg9: memref<16x256xbf16, #tpu.memory_space<vmem>>, %arg10: memref<48x32xf32, #tpu.memory_space<vmem>>) attributes {dimension_semantics = [#tpu.dimension_semantics<parallel>], iteration_bounds = array<i64: 2>, scalar_prefetch = 0 : i64, scratch_operands = 2 : i64, tpu.core_type = #tpu.core_type<tc>, window_params = [{transform_indices = @transform_0, window_bounds = array<i64: 1, 4, 256>}, {pipeline_mode = #tpu.pipeline_mode<synchronous>, transform_indices = @transform_1, window_bounds = array<i64: 4, 8, 16>}, {pipeline_mode = #tpu.pipeline_mode<synchronous>, transform_indices = @transform_2, window_bounds = array<i64: 8, 1>}, {pipeline_mode = #tpu.pipeline_mode<synchronous>, transform_indices = @transform_3, window_bounds = array<i64: 8, 1>}, {pipeline_mode = #tpu.pipeline_mode<synchronous>, transform_indices = @transform_4, window_bounds = array<i64: 8, 1>}, {pipeline_mode = #tpu.pipeline_mode<synchronous>, transform_indices = @transform_5, window_bounds = array<i64: 1, 208>}, {pipeline_mode = #tpu.pipeline_mode<synchronous>, transform_indices = @transform_6, window_bounds = array<i64: 32, 128>}, {transform_indices = @transform_7, window_bounds = array<i64: 1, 48, 128>}]} {
    %c0 = arith.constant 0 : index
    %c0_0 = arith.constant 0 : index
    %c0_1 = arith.constant 0 : index
    %0 = vector.load %arg1[%c0, %c0_0, %c0_1] : memref<1x4x256xbf16, #tpu.memory_space<vmem>>, vector<1x4x256xbf16>
    %1 = vector.shape_cast %0 : vector<1x4x256xbf16> to vector<4x256xbf16>
    %c0_2 = arith.constant 0 : index
    %c0_3 = arith.constant 0 : index
    %2 = vector.load %arg9[%c0_2, %c0_3] : memref<16x256xbf16, #tpu.memory_space<vmem>>, vector<4x256xbf16>
    tpu.vector_store %arg9[%c0_2, %c0_3], %1 {strides = array<i32>} : memref<16x256xbf16, #tpu.memory_space<vmem>>, vector<4x256xbf16>,
    %c0_4 = arith.constant 0 : index
    %c0_5 = arith.constant 0 : index
    %c1 = arith.constant 1 : index
    %3 = vector.load %arg1[%c0_4, %c0_5, %c1] : memref<1x4x256xbf16, #tpu.memory_space<vmem>>, vector<1x4x255xbf16>
    %4 = vector.shape_cast %3 : vector<1x4x255xbf16> to vector<4x255xbf16>
    %c4 = arith.constant 4 : index
    %c0_6 = arith.constant 0 : index
    %5 = vector.load %arg9[%c4, %c0_6] : memref<16x256xbf16, #tpu.memory_space<vmem>>, vector<4x255xbf16>
    tpu.vector_store %arg9[%c4, %c0_6], %4 {strides = array<i32>} : memref<16x256xbf16, #tpu.memory_space<vmem>>, vector<4x255xbf16>,
    %cst = arith.constant 0.000000e+00 : bf16
    %6 = vector.broadcast %cst : bf16 to vector<4x1xbf16>
    %c4_7 = arith.constant 4 : index
    %c255 = arith.constant 255 : index
    %7 = vector.load %arg9[%c4_7, %c255] : memref<16x256xbf16, #tpu.memory_space<vmem>>, vector<4x1xbf16>
    tpu.vector_store %arg9[%c4_7, %c255], %6 {strides = array<i32>} : memref<16x256xbf16, #tpu.memory_space<vmem>>, vector<4x1xbf16>,
    %c0_8 = arith.constant 0 : index
    %c0_9 = arith.constant 0 : index
    %c2 = arith.constant 2 : index
    %8 = vector.load %arg1[%c0_8, %c0_9, %c2] : memref<1x4x256xbf16, #tpu.memory_space<vmem>>, vector<1x4x254xbf16>
    %9 = vector.shape_cast %8 : vector<1x4x254xbf16> to vector<4x254xbf16>
    %c8 = arith.constant 8 : index
    %c0_10 = arith.constant 0 : index
    %10 = vector.load %arg9[%c8, %c0_10] : memref<16x256xbf16, #tpu.memory_space<vmem>>, vector<4x254xbf16>
    tpu.vector_store %arg9[%c8, %c0_10], %9 {strides = array<i32>} : memref<16x256xbf16, #tpu.memory_space<vmem>>, vector<4x254xbf16>,
    %cst_11 = arith.constant 0.000000e+00 : bf16
    %11 = vector.broadcast %cst_11 : bf16 to vector<4x2xbf16>
    %c8_12 = arith.constant 8 : index
    %c254 = arith.constant 254 : index
    %12 = vector.load %arg9[%c8_12, %c254] : memref<16x256xbf16, #tpu.memory_space<vmem>>, vector<4x2xbf16>
    tpu.vector_store %arg9[%c8_12, %c254], %11 {strides = array<i32>} : memref<16x256xbf16, #tpu.memory_space<vmem>>, vector<4x2xbf16>,
    %c0_13 = arith.constant 0 : index
    %c0_14 = arith.constant 0 : index
    %c3 = arith.constant 3 : index
    %13 = vector.load %arg1[%c0_13, %c0_14, %c3] : memref<1x4x256xbf16, #tpu.memory_space<vmem>>, vector<1x4x253xbf16>
    %14 = vector.shape_cast %13 : vector<1x4x253xbf16> to vector<4x253xbf16>
    %c12 = arith.constant 12 : index
    %c0_15 = arith.constant 0 : index
    %15 = vector.load %arg9[%c12, %c0_15] : memref<16x256xbf16, #tpu.memory_space<vmem>>, vector<4x253xbf16>
    tpu.vector_store %arg9[%c12, %c0_15], %14 {strides = array<i32>} : memref<16x256xbf16, #tpu.memory_space<vmem>>, vector<4x253xbf16>,
    %cst_16 = arith.constant 0.000000e+00 : bf16
    %16 = vector.broadcast %cst_16 : bf16 to vector<4x3xbf16>
    %c12_17 = arith.constant 12 : index
    %c253 = arith.constant 253 : index
    %17 = vector.load %arg9[%c12_17, %c253] : memref<16x256xbf16, #tpu.memory_space<vmem>>, vector<4x3xbf16>
    tpu.vector_store %arg9[%c12_17, %c253], %16 {strides = array<i32>} : memref<16x256xbf16, #tpu.memory_space<vmem>>, vector<4x3xbf16>,
    %c0_18 = arith.constant 0 : index
    %c0_19 = arith.constant 0 : index
    %c0_20 = arith.constant 0 : index
    %18 = vector.load %arg2[%c0_18, %c0_19, %c0_20] : memref<4x8x16xbf16, #tpu.memory_space<vmem>>, vector<1x8x16xbf16>
    %19 = vector.shape_cast %18 : vector<1x8x16xbf16> to vector<8x16xbf16>
    %c0_21 = arith.constant 0 : index
    %c0_22 = arith.constant 0 : index
    %20 = vector.load %arg9[%c0_21, %c0_22] : memref<16x256xbf16, #tpu.memory_space<vmem>>, vector<16x208xbf16>
    %cst_23 = arith.constant dense<0.000000e+00> : vector<8x208xf32>
    %21 = tpu.matmul %19, %20, %cst_23 {dimension_numbers = #tpu.dot_dimension_numbers<[1], [0], [0], [1], [0, 0, 1, 1], [], []>} : vector<8x16xbf16>, vector<16x208xbf16>, vector<8x208xf32> -> vector<8x208xf32>
    %c1_24 = arith.constant 1 : index
    %c0_25 = arith.constant 0 : index
    %c0_26 = arith.constant 0 : index
    %22 = vector.load %arg2[%c1_24, %c0_25, %c0_26] : memref<4x8x16xbf16, #tpu.memory_space<vmem>>, vector<1x8x16xbf16>
    %23 = vector.shape_cast %22 : vector<1x8x16xbf16> to vector<8x16xbf16>
    %c0_27 = arith.constant 0 : index
    %c16 = arith.constant 16 : index
    %24 = vector.load %arg9[%c0_27, %c16] : memref<16x256xbf16, #tpu.memory_space<vmem>>, vector<16x208xbf16>
    %cst_28 = arith.constant dense<0.000000e+00> : vector<8x208xf32>
    %25 = tpu.matmul %23, %24, %cst_28 {dimension_numbers = #tpu.dot_dimension_numbers<[1], [0], [0], [1], [0, 0, 1, 1], [], []>} : vector<8x16xbf16>, vector<16x208xbf16>, vector<8x208xf32> -> vector<8x208xf32>
    %26 = arith.addf %21, %25 : vector<8x208xf32>
    %c2_29 = arith.constant 2 : index
    %c0_30 = arith.constant 0 : index
    %c0_31 = arith.constant 0 : index
    %27 = vector.load %arg2[%c2_29, %c0_30, %c0_31] : memref<4x8x16xbf16, #tpu.memory_space<vmem>>, vector<1x8x16xbf16>
    %28 = vector.shape_cast %27 : vector<1x8x16xbf16> to vector<8x16xbf16>
    %c0_32 = arith.constant 0 : index
    %c32 = arith.constant 32 : index
    %29 = vector.load %arg9[%c0_32, %c32] : memref<16x256xbf16, #tpu.memory_space<vmem>>, vector<16x208xbf16>
    %cst_33 = arith.constant dense<0.000000e+00> : vector<8x208xf32>
    %30 = tpu.matmul %28, %29, %cst_33 {dimension_numbers = #tpu.dot_dimension_numbers<[1], [0], [0], [1], [0, 0, 1, 1], [], []>} : vector<8x16xbf16>, vector<16x208xbf16>, vector<8x208xf32> -> vector<8x208xf32>
    %31 = arith.addf %26, %30 : vector<8x208xf32>
    %c3_34 = arith.constant 3 : index
    %c0_35 = arith.constant 0 : index
    %c0_36 = arith.constant 0 : index
    %32 = vector.load %arg2[%c3_34, %c0_35, %c0_36] : memref<4x8x16xbf16, #tpu.memory_space<vmem>>, vector<1x8x16xbf16>
    %33 = vector.shape_cast %32 : vector<1x8x16xbf16> to vector<8x16xbf16>
    %c0_37 = arith.constant 0 : index
    %c48 = arith.constant 48 : index
    %34 = vector.load %arg9[%c0_37, %c48] : memref<16x256xbf16, #tpu.memory_space<vmem>>, vector<16x208xbf16>
    %cst_38 = arith.constant dense<0.000000e+00> : vector<8x208xf32>
    %35 = tpu.matmul %33, %34, %cst_38 {dimension_numbers = #tpu.dot_dimension_numbers<[1], [0], [0], [1], [0, 0, 1, 1], [], []>} : vector<8x16xbf16>, vector<16x208xbf16>, vector<8x208xf32> -> vector<8x208xf32>
    %36 = arith.addf %31, %35 : vector<8x208xf32>
    %c0_39 = arith.constant 0 : index
    %c0_40 = arith.constant 0 : index
    %37 = vector.load %arg6[%c0_39, %c0_40] : memref<1x208xf32, #tpu.memory_space<vmem>>, vector<1x208xf32>
    %38 = vector.broadcast %37 : vector<1x208xf32> to vector<8x208xf32>
    %39 = arith.mulf %36, %38 : vector<8x208xf32>
    %cst_41 = arith.constant dense<0.000000e+00> : vector<8xf32>
    %40 = vector.multi_reduction <add>, %39, %cst_41 [1] : vector<8x208xf32> to vector<8xf32>
    %41 = vector.shape_cast %40 : vector<8xf32> to vector<8x1xf32>
    %42 = arith.mulf %39, %36 : vector<8x208xf32>
    %cst_42 = arith.constant dense<0.000000e+00> : vector<8xf32>
    %43 = vector.multi_reduction <add>, %42, %cst_42 [1] : vector<8x208xf32> to vector<8xf32>
    %44 = vector.shape_cast %43 : vector<8xf32> to vector<8x1xf32>
    %cst_43 = arith.constant 5.917160e-03 : f32
    %45 = vector.broadcast %cst_43 : f32 to vector<8x1xf32>
    %46 = arith.mulf %41, %45 : vector<8x1xf32>
    %cst_44 = arith.constant 5.917160e-03 : f32
    %47 = vector.broadcast %cst_44 : f32 to vector<8x1xf32>
    %48 = arith.mulf %44, %47 : vector<8x1xf32>
    %49 = arith.mulf %46, %46 : vector<8x1xf32>
    %50 = arith.subf %48, %49 : vector<8x1xf32>
    %cst_45 = arith.constant 0.000000e+00 : f32
    %51 = vector.broadcast %cst_45 : f32 to vector<8x1xf32>
    %52 = arith.maximumf %50, %51 : vector<8x1xf32>
    %c0_46 = arith.constant 0 : index
    %c0_47 = arith.constant 0 : index
    %53 = vector.load %arg4[%c0_46, %c0_47] : memref<8x1xf32, #tpu.memory_space<vmem>>, vector<8x1xf32>
    %cst_48 = arith.constant 9.99999974E-6 : f32
    %54 = vector.broadcast %cst_48 : f32 to vector<8x1xf32>
    %55 = arith.addf %52, %54 : vector<8x1xf32>
    %56 = math.rsqrt %55 : vector<8x1xf32>
    %57 = arith.mulf %53, %56 : vector<8x1xf32>
    %c0_49 = arith.constant 0 : index
    %c0_50 = arith.constant 0 : index
    %58 = vector.load %arg5[%c0_49, %c0_50] : memref<8x1xf32, #tpu.memory_space<vmem>>, vector<8x1xf32>
    %59 = arith.mulf %46, %57 : vector<8x1xf32>
    %60 = arith.subf %58, %59 : vector<8x1xf32>
    %61 = vector.broadcast %57 : vector<8x1xf32> to vector<8x208xf32>
    %62 = arith.mulf %36, %61 : vector<8x208xf32>
    %63 = vector.broadcast %60 : vector<8x1xf32> to vector<8x208xf32>
    %64 = arith.addf %62, %63 : vector<8x208xf32>
    %cst_51 = arith.constant 0.000000e+00 : f32
    %65 = vector.broadcast %cst_51 : f32 to vector<8x208xf32>
    %66 = arith.cmpf oge, %64, %65 : vector<8x208xf32>
    %cst_52 = arith.constant 2.000000e-01 : f32
    %67 = vector.broadcast %cst_52 : f32 to vector<8x208xf32>
    %68 = arith.mulf %67, %64 : vector<8x208xf32>
    %69 = arith.select %66, %64, %68 : vector<8x208xi1>, vector<8x208xf32>
    %70 = vector.extract_strided_slice %69 {offsets = [0, 0], sizes = [8, 32], strides = [1, 1]} : vector<8x208xf32> to vector<8x32xf32>
    %c0_53 = arith.constant 0 : index
    %c0_54 = arith.constant 0 : index
    %71 = vector.load %arg10[%c0_53, %c0_54] : memref<48x32xf32, #tpu.memory_space<vmem>>, vector<8x32xf32>
    tpu.vector_store %arg10[%c0_53, %c0_54], %70 {strides = array<i32>} : memref<48x32xf32, #tpu.memory_space<vmem>>, vector<8x32xf32>,
    %72 = vector.extract_strided_slice %69 {offsets = [0, 32], sizes = [8, 32], strides = [1, 1]} : vector<8x208xf32> to vector<8x32xf32>
    %c8_55 = arith.constant 8 : index
    %c0_56 = arith.constant 0 : index
    %73 = vector.load %arg10[%c8_55, %c0_56] : memref<48x32xf32, #tpu.memory_space<vmem>>, vector<8x32xf32>
    tpu.vector_store %arg10[%c8_55, %c0_56], %72 {strides = array<i32>} : memref<48x32xf32, #tpu.memory_space<vmem>>, vector<8x32xf32>,
    %74 = vector.extract_strided_slice %69 {offsets = [0, 64], sizes = [8, 32], strides = [1, 1]} : vector<8x208xf32> to vector<8x32xf32>
    %c16_57 = arith.constant 16 : index
    %c0_58 = arith.constant 0 : index
    %75 = vector.load %arg10[%c16_57, %c0_58] : memref<48x32xf32, #tpu.memory_space<vmem>>, vector<8x32xf32>
    tpu.vector_store %arg10[%c16_57, %c0_58], %74 {strides = array<i32>} : memref<48x32xf32, #tpu.memory_space<vmem>>, vector<8x32xf32>,
    %76 = vector.extract_strided_slice %69 {offsets = [0, 96], sizes = [8, 32], strides = [1, 1]} : vector<8x208xf32> to vector<8x32xf32>
    %c24 = arith.constant 24 : index
    %c0_59 = arith.constant 0 : index
    %77 = vector.load %arg10[%c24, %c0_59] : memref<48x32xf32, #tpu.memory_space<vmem>>, vector<8x32xf32>
    tpu.vector_store %arg10[%c24, %c0_59], %76 {strides = array<i32>} : memref<48x32xf32, #tpu.memory_space<vmem>>, vector<8x32xf32>,
    %78 = vector.extract_strided_slice %69 {offsets = [0, 128], sizes = [8, 32], strides = [1, 1]} : vector<8x208xf32> to vector<8x32xf32>
    %c32_60 = arith.constant 32 : index
    %c0_61 = arith.constant 0 : index
    %79 = vector.load %arg10[%c32_60, %c0_61] : memref<48x32xf32, #tpu.memory_space<vmem>>, vector<8x32xf32>
    tpu.vector_store %arg10[%c32_60, %c0_61], %78 {strides = array<i32>} : memref<48x32xf32, #tpu.memory_space<vmem>>, vector<8x32xf32>,
    %80 = vector.extract_strided_slice %69 {offsets = [0, 160], sizes = [8, 32], strides = [1, 1]} : vector<8x208xf32> to vector<8x32xf32>
    %c40 = arith.constant 40 : index
    %c0_62 = arith.constant 0 : index
    %81 = vector.load %arg10[%c40, %c0_62] : memref<48x32xf32, #tpu.memory_space<vmem>>, vector<8x32xf32>
    tpu.vector_store %arg10[%c40, %c0_62], %80 {strides = array<i32>} : memref<48x32xf32, #tpu.memory_space<vmem>>, vector<8x32xf32>,
    %c0_63 = arith.constant 0 : index
    %c0_64 = arith.constant 0 : index
    %82 = vector.load %arg10[%c0_63, %c0_64] : memref<48x32xf32, #tpu.memory_space<vmem>>, vector<48x32xf32>
    %c0_65 = arith.constant 0 : index
    %c0_66 = arith.constant 0 : index
    %83 = vector.load %arg7[%c0_65, %c0_66] : memref<32x128xf32, #tpu.memory_space<vmem>>, vector<32x128xf32>
    %cst_67 = arith.constant dense<0.000000e+00> : vector<48x128xf32>
    %84 = tpu.matmul %82, %83, %cst_67 {dimension_numbers = #tpu.dot_dimension_numbers<[1], [0], [0], [1], [0, 0, 1, 1], [], []>} : vector<48x32xf32>, vector<32x128xf32>, vector<48x128xf32> -> vector<48x128xf32>
    %c0_68 = arith.constant 0 : index
    %c0_69 = arith.constant 0 : index
    %c0_70 = arith.constant 0 : index
    %85 = vector.load %arg8[%c0_68, %c0_69, %c0_70] : memref<1x48x128xf32, #tpu.memory_space<vmem>>, vector<1x48x128xf32>
    %86 = vector.shape_cast %85 : vector<1x48x128xf32> to vector<48x128xf32>
    %87 = vector.shape_cast %84 : vector<48x128xf32> to vector<1x48x128xf32>
    tpu.vector_store %arg8[%c0_68, %c0_69, %c0_70], %87 {strides = array<i32>} : memref<1x48x128xf32, #tpu.memory_space<vmem>>, vector<1x48x128xf32>,
    return
  }
  func.func @transform_0(%arg0: i32) -> (i32, i32, i32) {
    %c0_i32 = arith.constant 0 : i32
    %c0_i32_0 = arith.constant 0 : i32
    %c0_i32_1 = arith.constant 0 : i32
    return %arg0, %c0_i32, %c0_i32_0 : i32, i32, i32
  }
  func.func @transform_1(%arg0: i32) -> (i32, i32, i32) {
    %c0_i32 = arith.constant 0 : i32
    %c0_i32_0 = arith.constant 0 : i32
    %c0_i32_1 = arith.constant 0 : i32
    %c0_i32_2 = arith.constant 0 : i32
    return %c0_i32, %c0_i32_0, %c0_i32_1 : i32, i32, i32
  }
  func.func @transform_2(%arg0: i32) -> (i32, i32) {
    %c0_i32 = arith.constant 0 : i32
    %c0_i32_0 = arith.constant 0 : i32
    %c0_i32_1 = arith.constant 0 : i32
    return %c0_i32, %c0_i32_0 : i32, i32
  }
  func.func @transform_3(%arg0: i32) -> (i32, i32) {
    %c0_i32 = arith.constant 0 : i32
    %c0_i32_0 = arith.constant 0 : i32
    %c0_i32_1 = arith.constant 0 : i32
    return %c0_i32, %c0_i32_0 : i32, i32
  }
  func.func @transform_4(%arg0: i32) -> (i32, i32) {
    %c0_i32 = arith.constant 0 : i32
    %c0_i32_0 = arith.constant 0 : i32
    %c0_i32_1 = arith.constant 0 : i32
    return %c0_i32, %c0_i32_0 : i32, i32
  }
  func.func @transform_5(%arg0: i32) -> (i32, i32) {
    %c0_i32 = arith.constant 0 : i32
    %c0_i32_0 = arith.constant 0 : i32
    %c0_i32_1 = arith.constant 0 : i32
    return %c0_i32, %c0_i32_0 : i32, i32
  }
  func.func @transform_6(%arg0: i32) -> (i32, i32) {
    %c0_i32 = arith.constant 0 : i32
    %c0_i32_0 = arith.constant 0 : i32
    %c0_i32_1 = arith.constant 0 : i32
    return %c0_i32, %c0_i32_0 : i32, i32
  }
  func.func @transform_7(%arg0: i32) -> (i32, i32, i32) {
    %c0_i32 = arith.constant 0 : i32
    %c0_i32_0 = arith.constant 0 : i32
    %c0_i32_1 = arith.constant 0 : i32
    return %arg0, %c0_i32, %c0_i32_0 : i32, i32, i32
  }
}

</mosaic_0001>

<bundles_post_ra>
// kernel: tpu_custom_call.1
= control target key start
LH: loop header
LB: loop body
LE: loop exit
PB: predicated region body
PF: predicated region fallthrough
CT: control target
= control target key end

     0   :  { %12 = vsyncpa [#allocation5], 0  ;;  %s1521_s0 = inlined_call_operand.hbm [shape: bf16[2,4,256], index: 0, kind: input, shape index: {}]   ;;  %s1522_s1 = inlined_call_operand.vmem [shape: bf16[4,8,16], index: 1, kind: input, shape index: {}]   ;;  %s1523_s2 = inlined_call_operand.vmem [shape: f32[8,1], index: 2, kind: input, shape index: {}]   ;;  %s1524_s3 = inlined_call_operand.vmem [shape: f32[8,1], index: 3, kind: input, shape index: {}]   ;;  %s1525_s4 = inlined_call_operand.vmem [shape: f32[8,1], index: 4, kind: input, shape index: {}]   ;;  %s1526_s5 = inlined_call_operand.hbm [shape: f32[1,208], index: 5, kind: input, shape index: {}]   ;;  %s1527_s6 = inlined_call_operand.vmem [shape: f32[32,128], index: 6, kind: input, shape index: {}]   ;;  %s1528_s7 = inlined_call_operand.hbm [shape: f32[2,48,128], index: 7, kind: output, shape index: {}]  }
   0x1   :  { %14 = vsyncpa [#allocation5 + $0x1], 0 }
   0x2   :  { %15 = vsyncpa [#allocation8], 0 }
   0x3   :  { %16 = vsyncpa [#allocation6], 0 }
   0x4   :  { %18 = vsyncpa [#allocation6 + $0x1], 0  ;;  %s1250_s2 = smov 0   ;;  %s1252_s24 = smov 0  }
   0x5   :  { %s1254_s25 = smov 0   ;;  %s1256_s26 = smov 0  }
   0x6 LB: > { %s1271_s27 = sadd.s32 4294967295, %s1193_s26   ;;  %s914_s28 = sadd.s32 4294967294, %s1193_s26   ;;  %s1193_s26 = sphi %s1256_s26, %s1552_s26   ;;  %s1189_s25 = sphi %s1254_s25, %s1551_s25   ;;  %s1185_s24 = sphi %s1252_s24, %s1550_s24   ;;  %s1181_s2 = sphi %s1250_s2, %s1549_s2  }
   0x7   : > { %p44_p0 = scmp.ne.s32.totalorder %s1185_s24, %s1181_s2  ;;  %p1529_p1 = scmp.eq.s32.totalorder %s1271_s27, 0 }
   0x8   : > { %p200_p3 = scmp.eq.s32.totalorder %s914_s28, 1  ;;  %p915_p5 = scmp.ge.s32.totalorder %s1193_s26, 1 }
   0x9   : > { %p1280_p4 = por %p1529_p1, %p44_p0  ;;  %p207_p7 = scmp.lt.s32.totalorder %s1193_s26, 3 }
   0xa   : > { %p1285_p6 = por %p200_p3, %p44_p0  ;;  %s1195_s9 = smov [#allocation7]  }
   0xb   : > { %s1532_s29 = scalar_select %p1280_p4, 1, 0 }
   0xc   : > { %s1533_s30 = scalar_select %p1285_p6, 1, 0 }
   0xd   : > { %p1290_p8 = pnand %p915_p5, %p207_p7  ;;  %s232_s10 = sshll.u32 %s1195_s9, 4  ;;  %s233_s10 = int_to_ptr.vmem [resolvable:$true] %s232_s10 }
   0xe   : > { %s1298_s11 = sadd.s32 1, %s1193_s26   ;;  %s31_s15 = sadd.s32 1, %s1189_s25 }
   0xf   : > { %s1534_s8 = scalar_select %p1290_p8, 1, 0 }
  0x10   : > { %p998_p10 = pneg %p1290_p8  ;;  %s28_s13 = ssub.s32 %s1193_s26, %s1298_s11 }
  0x11   : > { %p1308_p12 = scmp.eq.s32.totalorder %s28_s13, 0  ;;  %s1065_s18 = scalar_lea.hbm %s1526_s5, 32 }
  0x12   : > { %p1302_p11 = pnand %p998_p10, %p1529_p1  ;;  %p1066_p0 = scmp.ne.s32.totalorder %s1526_s5, %s1065_s18 }
  0x13   : > { %s1536_s14 = scalar_select %p1308_p12, 1, 0 }
  0x14   : > { %p1067_p3 = pneg %p1302_p11  ;;  %p1072_p10 = scmp.lt.u32.totalorder %s1065_s18, %s1526_s5 }
  0x16   : > { %p1068_p5 = pnand %p1067_p3, %p1066_p0 }
  0x18   : > { %p1069_p7 = pneg %p1068_p5 }
  0x1a   : > { %p1074_p9 = pnand %p1072_p10, %p1069_p7 }
  0x1c   : > { %1077 = shalt.err (!%p1074_p9)
}
  0x1d   : > { %s1078_s23 = scalar_lea.vmem %s233_s10, 32  ;;  %p1086_p6 = scmp.lt.s32.totalorder %s233_s10, %s233_s10 }
  0x1e   : > { %p1079_p1 = scmp.ne.s32.totalorder %s233_s10, %s1078_s23  ;;  %p1087_p4 = scmp.lt.s32.totalorder %s1078_s23, %s1078_s23 }
  0x20   : > { %p1081_p2 = pnand %p1079_p1, %p1067_p3  ;;  %p1088_p8 = por %p1087_p4, %p1086_p6 }
  0x22   : > { %p1082_p13 = pneg %p1081_p2 }
  0x24   : > { %p1089_p12 = pnand %p1088_p8, %p1082_p13 }
  0x26   : > { %1092 = shalt.err (!%p1089_p12)
}
  0x27   : > { %1001 = dma.hbm_to_vmem [thread:$0]  (!%p1302_p11), %s1526_s5, 32, %s233_s10, [#allocation8]  }
  0x28   : > { %p1537_p1 = scmp.ne.s32.totalorder %s1536_s14, 0  ;;  %p39_p2 = scmp.eq.s32.totalorder %s1193_s26, 0 }
  0x29   : > { %p1538_p4 = scmp.ne.s32.totalorder %s1189_s25, %s1185_s24  ;;  %p1539_p6 = scmp.eq.s32.totalorder %s1271_s27, 1 }
  0x2a   : > { %s1334_s13 = scalar_select %p1537_p1, %s1189_s25, %s31_s15  }
  0x2b   : > { %p1342_p8 = por %p1539_p6, %p1538_p4  ;;  %p1011_p9 = scmp.lt.s32.totalorder %s1193_s26, 2 }
  0x2c   : > { %s246_s16 = sand.u32 1, %s1189_s25   ;;  %p1541_p12 = pmov %p1538_p4 }
  0x2d   : > { %s918_s17 = sshll.u32 %s246_s16, 2  ;;  %s942_s18 = sshll.u32 %s1193_s26, 6 }
  0x2e   : > { %p40_p13 = por %p39_p2, %p1541_p12  ;;  %s1355_s10 = scalar_lea.hbm %s1521_s0, %s942_s18 }
  0x2f   : > { %s250_s14 = scalar_lea.vmem [#allocation4], %s918_s17  ;;  %s247_s22 = scalar_lea.sflag [#allocation5], %s246_s16 }
  0x30   : > { %s258_s15 = sshll.u32 %s250_s14, 4  ;;  %p1357_p11 = pnand %p1011_p9, %p40_p13  ;;  %s1361_s15 = int_to_ptr.vmem [resolvable:$true] %s258_s15 }
  0x31   : > { %s1093_s23 = scalar_lea.hbm %s1355_s10, 64  ;;  %s1098_s17 = scalar_lea.hbm %s1521_s0, 128 }
  0x32   : > { %p1094_p0 = scmp.ne.s32.totalorder %s1355_s10, %s1093_s23  ;;  %p1095_p3 = pneg %p1357_p11 }
  0x33   : > { %p1099_p10 = scmp.lt.u32.totalorder %s1355_s10, %s1521_s0  ;;  %p1100_p1 = scmp.lt.u32.totalorder %s1098_s17, %s1093_s23 }
  0x34   : > { %p1096_p5 = pnand %p1095_p3, %p1094_p0  ;;  %p1102_p4 = scmp.lt.u32.totalorder %s1093_s23, %s1355_s10 }
  0x35   : > { %p1101_p2 = por %p1100_p1, %p1099_p10 }
  0x36   : > { %p1097_p7 = pneg %p1096_p5 }
  0x37   : > { %p1103_p6 = por %p1102_p4, %p1101_p2 }
  0x39   : > { %p1104_p9 = pnand %p1103_p6, %p1097_p7 }
  0x3b   : > { %1107 = shalt.err (!%p1104_p9)
}
  0x3c   : > { %s1108_s16 = scalar_lea.vmem %s1361_s15, 64  ;;  %s1196_s20 = smov [#allocation4]  }
  0x3d   : > { %p1109_p12 = scmp.ne.s32.totalorder %s1361_s15, %s1108_s16  ;;  %s1113_s14 = sshll.u32 %s1196_s20, 4  ;;  %s1114_s14 = int_to_ptr.vmem [resolvable:$false] %s1113_s14 }
  0x3e   : > { %s1115_s28 = scalar_lea.vmem %s1114_s14, 128  ;;  %p1116_p5 = scmp.lt.s32.totalorder %s1361_s15, %s1114_s14 }
  0x3f   : > { %p1111_p13 = pnand %p1109_p12, %p1095_p3  ;;  %p1117_p10 = scmp.lt.s32.totalorder %s1115_s28, %s1108_s16 }
  0x41   : > { %p1112_p0 = pneg %p1111_p13  ;;  %p1118_p1 = por %p1117_p10, %p1116_p5 }
  0x43   : > { %p1119_p2 = pnand %p1118_p1, %p1112_p0 }
  0x45   : > { %1122 = shalt.err (!%p1119_p2)
}
  0x46   : > { %1005 = dma.hbm_to_vmem [thread:$0]  (!%p1357_p11), %s1355_s10, 64, %s1361_s15, %s247_s22  }
  0x47   : > { %p1543_p7 = scmp.ne.s32.totalorder %s1534_s8, 0 }
  0x48   : > { %s1391_s23 = sand.u32 (!%p1543_p7), 1, %s1185_s24   ;;  %p1544_p3 = scmp.ne.s32.totalorder (!%p1543_p7), %s1532_s29, 0 }
  0x49   : > { %267 = sbr.rel (%p1543_p7) target bundleno = 1241 (0x4d9), region = 48  ;;  %s922_s9 = sshll.u32 (!%p1543_p7), %s1391_s23, 2 }
  0x4a   : > { %s270_s17 = scalar_lea.sflag (!%p1543_p7), [#allocation5], %s1391_s23  ;;  %s273_s18 = scalar_lea.vmem (!%p1543_p7), [#allocation4], %s922_s9 }
  0x50   : > { %1168 = dma.done.wait (%p1544_p3), %s270_s17, 64  }
  0x51   : > { %1170 = vsyncadd (%p1544_p3), %s270_s17, 4294967232  ;;  %p1545_p4 = scmp.eq.s32.totalorder %s1271_s27, 0 }
  0x53   : > { %1172 = dma.done.wait (%p1545_p4), [#allocation8], 32   ;;  %p1546_p11 = pmov %p1545_p4 }
  0x54   : > { %v329_v0 = vlaneseq  ;;  %v1197_v1 = vmov 1983009808   ;;  %v1198_v4 = vmov 0   ;;  %s1199_s29 = smov 126   ;;  %v1061_v9 = vld [vmem:[%s273_s18] ss:$0 sps:$4 sm:$0xff]  }
  0x55   : > { %1174 = vsyncadd (%p1546_p11), [#allocation8], 4294967264  ;;  %v327_v2 = vunpack.c.l.s4 %v1197_v1  ;;  %489 = vmatprep.mubr.bf16.mxu0 %v1198_v4  ;;  %445 = vmatprep.mubr.bf16.mxu1 %v1198_v4  ;;  %v925_v7 = vld.sshfl [vmem:[%s273_s18] sm:$0x33 pattern:$0x76325410] }
  0x56   : > { %v1403_v3 = vshrl.u32 %v329_v0, 7  ;;  %1059 = vset.pattern.permute.xlu0 %v1198_v4  ;;  %1060 = vset.pattern.permute.xlu1 %v1198_v4  ;;  %v356_v8 = vcombine.low %v925_v7, %v925_v7  ;;  %v1062_v10 = vld [vmem:[%s273_s18] ss:$0 sps:$4 sm:$0xff]   ;;  %v318_v11 = vcombine.high %v925_v7, %v925_v7  ;;  %321 = vst [vmem:[#allocation2] sm:$0x3] %v925_v7  ;;  %s1200_s8 = smov 127  }
  0x57   : > { %v328_v5 = vunpack.c.0.s8 %v327_v2  ;;  %359 = vrot.lane.b32.xlu1 %v925_v7, %s1199_s29  ;;  %s1201_s10 = smov 125   ;;  %vm366_vm0 = vcmask 1029124   ;;  %vm368_vm1 = vcmask 1046516   ;;  %vm361_vm2 = vcmask 1031168   ;;  %s1202_s15 = smov 96   ;;  %v640_v7 = vld [vmem:[%s1524_s3] sm:$0xff] }
  0x58   : > { %322 = vst [vmem:[#allocation2 + $0x8] sm:$0x3] %v318_v11  ;;  %vm338_vm3 = vcmask 1039360   ;;  %vm343_vm4 = vcmask 1035266   ;;  %vm390_vm5 = vcmask 1022982   ;;  %vm345_vm6 = vcmask 1044474  }
  0x59   : > { %v331_v6 = vsub.s32 %v328_v5, %v1403_v3  ;;  %vm392_vm7 = vcmask 1048558   ;;  %vm385_vm8 = vcmask 1022976   ;;  %v394_v27 = vld [vmem:[%s1522_s1] sm:$0xf]  ;;  %vm409_vm9 = vcmask 130048   ;;  %s1203_s19 = smov 112  }
  0x5a   : > { %s1204_s16 = smov 80   ;;  %vm504_vm10 = vcmask 785408   ;;  %v929_v32 = vld [vmem:[%s1522_s1 + $0x8] sm:$0xf]  ;;  %vm405_vm11 = vcmask 916480   ;;  %vm560_vm12 = vcmask 654336  }
  0x5b   : > { %v332_v12 = vrot.slane %v1061_v9, %v331_v6  ;;  %357 = vrot.lane.b32.xlu1 %v356_v8, %s1199_s29  ;;  %v379_v14 = vrot.slane %v1062_v10, %v331_v6  ;;  %v926_v36 = vld [vmem:[%s1522_s1 + $0x4] sm:$0xf]  ;;  %v931_v39 = vld [vmem:[%s1522_s1 + $0xc] sm:$0xf]  ;;  %v614_v44 = vsub.s32 0, %v1403_v3  ;;  %v618_v46 = vsub.s32 1, %v1403_v3 }
  0x5c   : > { %v610_v45 = vld [vmem:[#allocation7] sm:$0x3]  ;;  %v644_v10 = vld [vmem:[%s1525_s4] sm:$0xff]  ;;  %vm667_vm13 = vcmask 261120   ;;  %s1205_s18 = smov 64   ;;  %s1206_s29 = smov 32  }
  0x5d   : > { %334 = vrot.lane.b32.xlu0 %v332_v12, %s1200_s8  ;;  %v333_v13 = vcombine.high %v332_v12, %v332_v12  ;;  %v380_v15 = vcombine.low %v379_v14, %v379_v14  ;;  %v615_v47 = vrot.slane %v610_v45, %v614_v44  ;;  %v619_v49 = vrot.slane %v610_v45, %v618_v46  ;;  %s989_s21 = smul.u32 768, %s1271_s27  ;;  %s818_s20 = scalar_lea.sflag [#allocation6], %s1391_s23 }
  0x5e   : > { %s1207_s14 = smov [#allocation9]  }
  0x5f   : > { %383 = vrot.lane.b32.xlu1 %v379_v14, %s1201_s10  ;;  %v695_v14 = vld [vmem:[%s1527_s6 + $0x8] sm:$0xff]  ;;  %s1127_s28 = sshll.u32 %s1207_s14, 4  ;;  %s1128_s28 = int_to_ptr.vmem [resolvable:$false] %s1127_s28 }
  0x60   : > { %s1129_s9 = scalar_lea.vmem %s1128_s28, 1536 }
  0x61   : > { %336 = vrot.lane.b32.xlu0 %v333_v13, %s1200_s8  ;;  %v694_v13 = vld [vmem:[%s1527_s6] sm:$0xff] }
  0x65   : > { %381 = vrot.lane.b32.xlu0 %v380_v15, %s1201_s10  ;;  %v970_v15 = vpack.c.bf16 %v695_v14, %v694_v13 }
  0xc9   : > { %v360_v16 = vpop.permute.xlu1 %359 }
  0xca   : > { %367 = vst.msk [vmem:[#allocation2 + $0x8] sm:$0x30] %vm366_vm0, %v360_v16 }
  0xcb   : > { %369 = vst.msk [vmem:[#allocation2 + $0x8] sm:$0x30] %vm368_vm1, %v1198_v4 }
  0xcd   : > { %v358_v17 = vpop.permute.xlu1 %357 }
  0xce   : > { %v362_v19 = vsel %vm361_vm2, %v358_v17, %v360_v16  ;;  %v696_v16 = vld [vmem:[%s1527_s6 + $0x10] sm:$0xff]  ;;  %v697_v17 = vld [vmem:[%s1527_s6 + $0x18] sm:$0xff] }
  0xcf   : > { %v335_v18 = vpop.permute.xlu0 %334  ;;  %365 = vst [vmem:[#allocation2] sm:$0x30] %v362_v19 }
  0xd1   : > { %v384_v21 = vpop.permute.xlu1 %383 }
  0xd2   : > { %391 = vst.msk [vmem:[#allocation2 + $0x8] sm:$0xc0] %vm390_vm5, %v384_v21 }
  0xd3   : > { %v337_v20 = vpop.permute.xlu0 %336  ;;  %393 = vst.msk [vmem:[#allocation2 + $0x8] sm:$0xc0] %vm392_vm7, %v1198_v4 }
  0xd4   : > { %v339_v22 = vsel %vm338_vm3, %v335_v18, %v337_v20  ;;  %344 = vst.msk [vmem:[#allocation2 + $0x8] sm:$0xc] %vm343_vm4, %v337_v20  ;;  %v974_v18 = vpack.c.bf16 %v697_v17, %v696_v16 }
  0xd5   : > { %342 = vst [vmem:[#allocation2] sm:$0xc] %v339_v22  ;;  %346 = vst.msk [vmem:[#allocation2 + $0x8] sm:$0xc] %vm345_vm6, %v1198_v4 }
  0xd7   : > { %v382_v23 = vpop.permute.xlu0 %381 }
  0xd8   : > { %v386_v24 = vsel %vm385_vm8, %v382_v23, %v384_v21 }
  0xd9   : > { %389 = vst [vmem:[#allocation2] sm:$0xc0] %v386_v24 }
  0xdc   : > { %v396_v25 = vld [vmem:[#allocation2 + $0x8] sm:$0xff] }
  0xdd   : > { %457 = vmatprep.subr.bf16.mxu0 %v396_v25  ;;  %502 = vrot.lane.b32.xlu1 %v396_v25, %s1202_s15 }
  0xe0   : > { %v395_v26 = vld [vmem:[#allocation2] sm:$0xff] }
  0xe1   : > { %500 = vrot.lane.b32.xlu0 %v395_v26, %s1202_s15  ;;  %458 = vmatpush1.bf16.msra.mxu0 %v395_v26 }
  0xe2   : > { %403 = vrot.lane.b32.xlu1 %v396_v25, %s1203_s19 }
  0xe4   : > { %928 = vmatmul.mubr.msk.bf16.vlgmr.msra.gmra.mrb[0].mxu0 %vm409_vm9, %v394_v27 }
  0xe5   : > { %401 = vrot.lane.b32.xlu0 %v395_v26, %s1203_s19  ;;  %543 = vmatprep.mubr.bf16.mxu0 %v1198_v4 }
  0xe6   : > { %558 = vrot.lane.b32.xlu1 %v396_v25, %s1204_s16 }
  0xe9   : > { %556 = vrot.lane.b32.xlu0 %v395_v26, %s1204_s16  ;;  %s1477_s16 = scalar_lea.hbm %s1528_s7, %s989_s21 }
 0x14f   : > { %v503_v28 = vpop.permute.xlu1 %502 }
 0x150   : > { %511 = vmatprep.subr.bf16.mxu0 %v503_v28 }
 0x153   : > { %v501_v29 = vpop.permute.xlu0 %500 }
 0x154   : > { %v505_v30 = vsel %vm504_vm10, %v501_v29, %v503_v28  ;;  %v404_v31 = vpop.permute.xlu1 %403 }
 0x155   : > { %512 = vmatpush1.bf16.msra.mxu0 %v505_v30  ;;  %413 = vmatprep.subr.bf16.mxu1 %v404_v31 }
 0x157   : > { %v402_v33 = vpop.permute.xlu0 %401 }
 0x158   : > { %930 = vmatmul.mubr.msk.bf16.vlgmr.msra.gmra.mrb[0].mxu0 %vm409_vm9, %v929_v32  ;;  %v406_v34 = vsel %vm405_vm11, %v402_v33, %v404_v31  ;;  %v559_v35 = vpop.permute.xlu1 %558 }
 0x159   : > { %414 = vmatpush1.bf16.msra.mxu1 %v406_v34  ;;  %567 = vmatprep.subr.bf16.mxu0 %v559_v35 }
 0x15a   : > { %599 = vmatprep.mubr.bf16.mxu0 %v1198_v4  ;;  %971 = vmatprep.subr.bf16.mxu1 %v970_v15 }
 0x15b   : > { %v557_v37 = vpop.permute.xlu0 %556 }
 0x15c   : > { %v561_v38 = vsel %vm560_vm12, %v557_v37, %v559_v35  ;;  %927 = vmatmul.mubr.msk.bf16.vlgmr.msra.gmra.mrb[0].mxu1 %vm409_vm9, %v926_v36 }
 0x15d   : > { %568 = vmatpush1.bf16.msra.mxu0 %v561_v38  ;;  %973 = vmatpush3.bf16.msra.mxu1 %v970_v15 }
 0x15e   : > { %975 = vmatprep.subr.bf16.mxu1 %v974_v18 }
 0x161   : > { %977 = vmatpush3.bf16.msra.mxu1 %v974_v18 }
 0x164   : > { %932 = vmatmul.mubr.msk.bf16.vlgmr.msra.gmra.mrb[0].mxu0 %vm409_vm9, %v931_v39 }
 0x22f   : > { %v447_v40 = vpop.f32.mrb[0].mxu1 }
 0x230   : > { %v449_v41 = vpop.f32.mrb[1].mxu1 }
 0x231   : > { %v451_v42 = vpop.f32.mrb[2].mxu1 }
 0x232   : > { %v452_v43 = vpop.f32.mrb[3].mxu1 }
 0x237   : > { %v601_v48 = vpop.f32.mrb[0].mxu0 }
 0x238   : > { %v978_v50 = vadd.f32 %v601_v48, %v447_v40  ;;  %v603_v51 = vpop.f32.mrb[1].mxu0 }
 0x239   : > { %v979_v52 = vadd.f32 %v603_v51, %v449_v41  ;;  %v605_v53 = vpop.f32.mrb[2].mxu0 }
 0x23a   : > { %v606_v54 = vpop.f32.mrb[3].mxu0  ;;  %v622_v55 = vmul.f32 %v978_v50, %v615_v47 }
 0x23b   : > { %v623_v56 = vmul.f32 %v979_v52, %v619_v49 }
 0x23c   : > { %v629_v60 = vmul.f32 %v978_v50, %v622_v55 }
 0x23d   : > { %v625_v57 = vsel %vm560_vm12, %v623_v56, 0.0  ;;  %v630_v58 = vmul.f32 %v979_v52, %v623_v56 }
 0x23e   : > { %v626_v59 = vadd.f32 %v625_v57, %v622_v55 }
 0x23f   : > { %v631_v61 = vsel %vm560_vm12, %v630_v58, 0.0 }
 0x240   : > { %627 = vadd.xlane.f32.xlu0 %v626_v59  ;;  %v632_v62 = vadd.f32 %v631_v61, %v629_v60 }
 0x242   : > { %633 = vadd.xlane.f32.xlu1 %v632_v62 }
 0x2cd   : > { %v628_v63 = vpop.xlane.xlu0 %627 }
 0x2ce   : > { %v635_v0 = vmul.f32 0.00591716, %v628_v63 }
 0x2cf   : > { %v634_v1 = vpop.xlane.xlu1 %633 }
 0x2d0   : > { %v637_v2 = vmul.f32 %v635_v0, %v635_v0  ;;  %v636_v3 = vmul.f32 0.00591716, %v634_v1 }
 0x2d2   : > { %v638_v4 = vsub.f32 %v636_v3, %v637_v2 }
 0x2d4   : > { %v639_v5 = vmax.f32 %v638_v4, 0.0 }
 0x2d6   : > { %v641_v6 = vadd.f32 1e-05, %v639_v5 }
 0x2d8   : > { %1063 = vrsqrt.f32 %v641_v6 }
 0x2e2   : > { %v1064_v8 = vpop.eup %1063 }
 0x2e3   : > { %v643_v9 = vmul.f32 %v1064_v8, %v640_v7 }
 0x2e5   : > { %649 = vperm.xlu0 %1059, %v643_v9   ;;  %v645_v11 = vmul.f32 %v643_v9, %v635_v0 }
 0x2e7   : > { %v646_v12 = vsub.f32 %v644_v10, %v645_v11 }
 0x2e9   : > { %656 = vperm.xlu1 %1060, %v646_v12  }
 0x364   : > { %v650_v19 = vpop.permute.xlu0 %649 }
 0x365   : > { %v652_v20 = vmul.f32 %v978_v50, %v650_v19  ;;  %v653_v21 = vmul.f32 %v979_v52, %v650_v19 }
 0x368   : > { %v657_v22 = vpop.permute.xlu1 %656 }
 0x369   : > { %v659_v23 = vadd.f32 %v657_v22, %v652_v20  ;;  %v660_v24 = vadd.f32 %v657_v22, %v653_v21 }
 0x36b   : > { %v663_v25 = vmul.f32 0.2, %v659_v23  ;;  %vm661_vm14 = vcmp.ge.f32.partialorder %v659_v23, 0.0  ;;  %vm662_vm15 = vcmp.ge.f32.partialorder %v660_v24, 0.0  ;;  %v664_v26 = vmul.f32 0.2, %v660_v24 }
 0x36d   : > { %v665_v27 = vsel %vm661_vm14, %v659_v23, %v663_v25  ;;  %v666_v28 = vsel %vm662_vm15, %v660_v24, %v664_v26 }
 0x36e   : > { %670 = vrot.lane.b32.xlu1 %v665_v27, %s1202_s15  ;;  %668 = vst.msk [vmem:[#allocation3] sm:$0xff] %vm667_vm13, %v665_v27  ;;  %682 = vst.msk [vmem:[#allocation3 + $0x20] sm:$0xff] %vm667_vm13, %v666_v28 }
 0x372   : > { %674 = vrot.lane.b32.xlu1 %v665_v27, %s1205_s18 }
 0x375   : > { %v688_v29 = vld [vmem:[#allocation3] sm:$0xff] }
 0x376   : > { %678 = vrot.lane.b32.xlu1 %v665_v27, %s1206_s29  ;;  %961 = vmatprep.mubr.msk.f32.mxu1 %vm667_vm13, %v688_v29  ;;  %v692_v37 = vld [vmem:[#allocation3 + $0x20] sm:$0xff] }
 0x37a   : > { %684 = vrot.lane.b32.xlu1 %v666_v28, %s1202_s15  ;;  %s988_s15 = smul.u32 48, %s1391_s23 }
 0x37c   : > { %s307_s8 = scalar_lea.vmem [#allocation9], %s988_s15 }
 0x37d   : > { %s831_s10 = sshll.u32 %s307_s8, 4  ;;  %s1472_s10 = int_to_ptr.vmem [resolvable:$true] %s831_s10 }
 0x37e   : > { %s1123_s27 = scalar_lea.vmem %s1472_s10, 768  ;;  %p1130_p13 = scmp.lt.s32.totalorder %s1472_s10, %s1128_s28 }
 0x37f   : > { %p1124_p6 = scmp.ne.s32.totalorder %s1472_s10, %s1123_s27  ;;  %p1131_p0 = scmp.lt.s32.totalorder %s1129_s9, %s1123_s27 }
 0x381   : > { %p1125_p9 = pnand %p1124_p6, %p1342_p8  ;;  %p1132_p5 = por %p1131_p0, %p1130_p13 }
 0x383   : > { %p1126_p12 = pneg %p1125_p9 }
 0x385   : > { %p1133_p10 = pnand %p1132_p5, %p1126_p12 }
 0x3e0   : > { %v671_v30 = vpop.permute.xlu1 %670 }
 0x3e1   : > { %673 = vst.msk [vmem:[#allocation3 + $0x8] sm:$0xff] %vm667_vm13, %v671_v30 }
 0x3e4   : > { %v675_v31 = vpop.permute.xlu1 %674 }
 0x3e5   : > { %677 = vst.msk [vmem:[#allocation3 + $0x10] sm:$0xff] %vm667_vm13, %v675_v31 }
 0x3e8   : > { %v679_v32 = vpop.permute.xlu1 %678  ;;  %v689_v33 = vld [vmem:[#allocation3 + $0x8] sm:$0xff] }
 0x3e9   : > { %681 = vst.msk [vmem:[#allocation3 + $0x18] sm:$0xff] %vm667_vm13, %v679_v32  ;;  %962 = vmatmul.mubr.msk.f32.vlgmr.msra.gmra.mrb[4].mxu1 %vm667_vm13, %v689_v33 }
 0x3ec   : > { %v685_v34 = vpop.permute.xlu1 %684  ;;  %v690_v35 = vld [vmem:[#allocation3 + $0x10] sm:$0xff] }
 0x3ed   : > { %687 = vst.msk [vmem:[#allocation3 + $0x28] sm:$0xff] %vm667_vm13, %v685_v34  ;;  %964 = vmatprep.mubr.msk.f32.mxu1 %vm667_vm13, %v690_v35 }
 0x3f0   : > { %v691_v36 = vld [vmem:[#allocation3 + $0x18] sm:$0xff] }
 0x3f1   : > { %965 = vmatmul.mubr.msk.f32.gmra.mrb[6].mxu1 %vm667_vm13, %v691_v36 }
 0x3f2   : > { %967 = vmatprep.mubr.msk.f32.mxu1 %vm667_vm13, %v692_v37 }
 0x3f4   : > { %v693_v38 = vld [vmem:[#allocation3 + $0x28] sm:$0xff] }
 0x3f5   : > { %968 = vmatmul.mubr.msk.f32.gmra.mrb[8].mxu1 %vm667_vm13, %v693_v38 }
 0x4bc   : > { %v963_v39 = vpop.f32.mrb[4].mxu1 }
 0x4bd   : > { %812 = vst [vmem:[%s307_s8 + $0x8] sm:$0xff] %v963_v39  ;;  %v782_v40 = vpop.f32.mrb[5].mxu1 }
 0x4be   : > { %811 = vst [vmem:[%s307_s8] sm:$0xff] %v782_v40 }
 0x4c4   : > { %v966_v41 = vpop.f32.mrb[6].mxu1 }
 0x4c5   : > { %814 = vst [vmem:[%s307_s8 + $0x18] sm:$0xff] %v966_v41  ;;  %v792_v42 = vpop.f32.mrb[7].mxu1 }
 0x4c6   : > { %813 = vst [vmem:[%s307_s8 + $0x10] sm:$0xff] %v792_v42 }
 0x4c8   : > { %v969_v43 = vpop.f32.mrb[8].mxu1 }
 0x4c9   : > { %816 = vst [vmem:[%s307_s8 + $0x28] sm:$0xff] %v969_v43  ;;  %v802_v44 = vpop.f32.mrb[9].mxu1 }
 0x4ca   : > { %815 = vst [vmem:[%s307_s8 + $0x20] sm:$0xff] %v802_v44 }
 0x4cb   : > { %1136 = shalt.err (!%p1133_p10)
}
 0x4cc   : > { %s1137_s17 = scalar_lea.hbm %s1477_s16, 768  ;;  %s1141_s15 = scalar_lea.hbm %s1528_s7, 1536 }
 0x4cd   : > { %p1138_p1 = scmp.ne.s32.totalorder %s1477_s16, %s1137_s17  ;;  %p1142_p3 = scmp.lt.u32.totalorder %s1477_s16, %s1528_s7 }
 0x4ce   : > { %p1143_p4 = scmp.lt.u32.totalorder %s1141_s15, %s1137_s17  ;;  %p1145_p6 = scmp.lt.u32.totalorder %s1137_s17, %s1477_s16 }
 0x4cf   : > { %p1139_p2 = pnand %p1138_p1, %p1342_p8 }
 0x4d0   : > { %p1144_p11 = por %p1143_p4, %p1142_p3 }
 0x4d1   : > { %p1140_p7 = pneg %p1139_p2 }
 0x4d2   : > { %p1146_p9 = por %p1145_p6, %p1144_p11 }
 0x4d4   : > { %p1147_p12 = pnand %p1146_p9, %p1140_p7 }
 0x4d6   : > { %1150 = shalt.err (!%p1147_p12)
}
 0x4d7   : > { %s1208_s22 = smov 128   ;;  %s1209_s19 = smov 8  }
 0x4d8   : > { %996 = dma.vmem_to_hbm [thread:$0]  (%p1342_p8), %s1472_s10, 768, %s1477_s16, %s818_s20, %s1208_s22, %s1208_s22, %s1209_s19  }
 0x4d9 PF: > { %s846_s27 = sand.u32 1, %s1181_s2   ;;  %p1547_p13 = scmp.ne.s32.totalorder %s1533_s30, 0 }
 0x4da   : > { %p1548_p0 = scmp.ge.s32.totalorder %s1193_s26, 2  ;;  %s847_s14 = scalar_lea.sflag [#allocation6], %s846_s27 }
 0x4dc   : > { %p1007_p5 = pnand %p1548_p0, %p1547_p13 }
 0x4de   : > { %1176 = dma.done.wait (!%p1007_p5), %s847_s14, 768  }
 0x4df   : > { %1178 = vsyncadd (!%p1007_p5), %s847_s14, 4294966528  ;;  %p21_p10 = scmp.ge.s32.totalorder %s1298_s11, 4   ;;  %s1549_s2 = smov %s1185_s24 }
 0x4e0   : > { %s1550_s24 = smov %s1189_s25  ;;  %s1551_s25 = smov %s1334_s13 }
 0x4e1   : > { %s1552_s26 = smov %s1298_s11  ;;  %23 = sbr.rel (!%p21_p10) target bundleno = 6 (0x6), region = 100 }
 0x4e8   :  { %852 = vsyncpa [#allocation5], 1 }
 0x4e9   :  { %854 = vsyncpa [#allocation5 + $0x1], 1 }
 0x4ea   :  { %855 = vsyncpa [#allocation8], 1 }
 0x4eb   :  { %856 = vsyncpa [#allocation6], 1 }
 0x4ec   :  { %858 = vsyncpa [#allocation6 + $0x1], 1 }

</bundles_post_ra>
